<compile_context>
chip_gen: v5e
topology: v5e:2x2
jax: 0.10.0
libtpu: 0.0.40
codegen_flags: <defaults>
</compile_context>

<pallas_src>
import functools

import jax
import jax.numpy as jnp
from jax import lax
from jax.experimental import pallas as pl
from jax.experimental.pallas import tpu as pltpu


def _cdiv(a: int, b: int) -> int:
    return (a + b - 1) // b


def _round_up(v: int, m: int) -> int:
    return _cdiv(v, m) * m


def _vmem_capacity_bytes() -> int:
    try:
        return int(pltpu.get_tpu_info().vmem_capacity_bytes)
    except Exception:
        return 64 * 1024 * 1024  # conservative fallback: v7x per-TC VMEM


def _comment_logsoftmax_kernel(x_ref, w_ref, b_ref, o_ref, xsum_ref, *,
                               seq_len: int, ts: int, n_classes: int,
                               cp: int, mask_seq_tail: bool):
    """x_ref: (TB, TS, H), w_ref: (H, Cp), b_ref: (1, Cp) [= S*bias, f32],
    o_ref: (TB, Cp), xsum_ref: f32 VMEM scratch (TB, H)."""
    s = pl.program_id(1)

    @pl.when(s == 0)
    def _init():
        xsum_ref[...] = jnp.zeros_like(xsum_ref)

    x = x_ref[...].astype(jnp.float32)
    if mask_seq_tail:
        # Zero tokens past seq_len (the last seq tile may read OOB garbage).
        tok = lax.broadcasted_iota(jnp.int32, x.shape, 1)
        x = jnp.where(tok < (seq_len - s * ts), x, 0.0)
    # Accumulate the per-comment token sum for this batch tile.
    xsum_ref[...] += jnp.sum(x, axis=1)

    @pl.when(s == pl.num_programs(1) - 1)
    def _finalize():
        # (sum_s x) @ W_t + S*b  — W_t is (H, Cp), canonical MK x KN.
        logits = jnp.dot(xsum_ref[...], w_ref[...],
                         preferred_element_type=jnp.float32)
        logits = logits + b_ref[...]

        if n_classes != cp:
            # Mask padded class lanes so they don't corrupt max / logsumexp.
            col = lax.broadcasted_iota(jnp.int32, logits.shape, 1)
            logits = jnp.where(col < n_classes, logits, -jnp.inf)

        # Numerically stable log-softmax (f32 epilogue).
        m = jnp.max(logits, axis=-1, keepdims=True)
        shifted = logits - m
        lse = jnp.log(jnp.sum(jnp.exp(shifted), axis=-1, keepdims=True))
        o_ref[...] = (shifted - lse).astype(o_ref.dtype)


def comment_wise_linear_log_softmax(x, weight, bias, mask=None, *,
                                    max_seq_tile=None):
    """x: (batch, seq, model_size); weight: (output_size, model_size) [PyTorch
    layout]; bias: (output_size,). Returns (batch, output_size) log-probs.
    `mask` is accepted for API parity but is a no-op (see header comment).
    `max_seq_tile` optionally caps the seq tile (testing / tuning)."""
    del mask
    batch, seq, hidden = x.shape
    n_classes = weight.shape[0]

    cp = _round_up(n_classes, 128)
    out_dtype = jnp.promote_types(x.dtype, jnp.float32)
    x_item = jnp.dtype(x.dtype).itemsize
    w_item = jnp.dtype(weight.dtype).itemsize
    out_item = jnp.dtype(out_dtype).itemsize

    # ---- batch tile: keep the output block layout-legal, and split into >= 2
    # tiles when batch allows so the "parallel" axis shards on v7x's two TCs.
    if batch <= 8:
        tb = batch                      # full-extent block (layout-legal)
    else:
        tb = min(128, _round_up(_cdiv(batch, 2), 8))

    # ---- seq tile from the per-generation VMEM budget (v7x 64 MiB vs
    # v5e/v6e 128 MiB): shrink the reduction axis, never M or the output N.
    vmem_cap = _vmem_capacity_bytes()
    budget = int(0.80 * vmem_cap)
    hp = _round_up(hidden, 128)         # lane-padded hidden (layout, not HBM)
    tb8 = _round_up(tb, 8)
    fixed = (2 * _round_up(hidden, 8) * cp * w_item   # resident weight
             + 2 * 8 * cp * 4                          # bias block
             + 2 * tb8 * cp * out_item                 # output block (dbl-buf)
             + tb8 * hp * 4)                           # f32 xsum scratch
    per_token = 2 * tb * hp * x_item                   # dbl-buffered x / token
    ts_budget = max((budget - fixed) // max(per_token, 1), 8)
    if seq <= 8:
        ts = seq                        # full-extent block (layout-legal)
    else:
        ts = min(_round_up(seq, 8), 2048, max(8, (ts_budget // 8) * 8))
        if max_seq_tile is not None:
            ts = max(8, min(ts, _round_up(max_seq_tile, 8)))
    mask_seq_tail = (seq % ts) != 0

    grid = (_cdiv(batch, tb), _cdiv(seq, ts))

    # ---- one-time host-side parameter prep (tiny): transpose + class-pad the
    # weight to (H, Cp); fold the seq_len scale into a padded f32 bias.
    w_t = jnp.zeros((hidden, cp), weight.dtype).at[:, :n_classes].set(weight.T)
    b_scaled = (jnp.zeros((1, cp), jnp.float32)
                .at[0, :n_classes].set(bias.astype(jnp.float32)
                                       * jnp.float32(seq)))

    # ---- VMEM limit: generation-aware, no double counting.
    need = fixed + 2 * tb * _round_up(ts, 8) * hp * x_item
    vmem_limit = int(min(max(int(1.25 * need), 16 * 1024 * 1024),
                         int(0.90 * vmem_cap)))

    cost = pl.CostEstimate(
        flops=2 * batch * hidden * cp + batch * seq * hidden,
        transcendentals=batch * cp,
        bytes_accessed=(x.size * x_item + w_t.size * w_item
                        + b_scaled.size * 4 + batch * cp * out_item),
    )

    kernel = functools.partial(
        _comment_logsoftmax_kernel,
        seq_len=seq, ts=ts, n_classes=n_classes, cp=cp,
        mask_seq_tail=mask_seq_tail)

    out_p = pl.pallas_call(
        kernel,
        out_shape=jax.ShapeDtypeStruct((batch, cp), out_dtype),
        grid_spec=pltpu.PrefetchScalarGridSpec(
            num_scalar_prefetch=0,
            grid=grid,
            in_specs=[
                # x streamed over batch/seq tiles; hidden kept full-extent.
                pl.BlockSpec((tb, ts, hidden), lambda b, s: (b, s, 0)),
                # weight / bias resident in VMEM across the whole grid.
                pl.BlockSpec((hidden, cp), lambda b, s: (0, 0)),
                pl.BlockSpec((1, cp), lambda b, s: (0, 0)),
            ],
            out_specs=pl.BlockSpec((tb, cp), lambda b, s: (b, 0)),
            scratch_shapes=[pltpu.VMEM((tb, hidden), jnp.float32)],
        ),
        compiler_params=pltpu.CompilerParams(
            dimension_semantics=("parallel", "arbitrary"),
            vmem_limit_bytes=vmem_limit,
        ),
        cost_estimate=cost,
    )(x, w_t, b_scaled)

    return out_p[:, :n_classes]


if __name__ == "__main__":
    key = jax.random.PRNGKey(0)

    def _reference(x, w, b):
        logits = jnp.einsum("bsh,ch->bsc", x, w) + b
        return jax.nn.log_softmax(jnp.sum(logits, axis=1), axis=-1)

    # Config 1: single seq tile; hidden / classes not 128-multiples.
    b1, s1, h1, c1 = 2, 8, 32, 16
    k1, k2, k3, key = jax.random.split(key, 4)
    x1 = jax.random.normal(k1, (b1, s1, h1), jnp.float32)
    w1 = jax.random.normal(k2, (c1, h1), jnp.float32) * 0.1
    bias1 = jax.random.normal(k3, (c1,), jnp.float32) * 0.1
    out1 = jax.block_until_ready(comment_wise_linear_log_softmax(x1, w1, bias1))
    ref1 = _reference(x1, w1, bias1)
    assert out1.shape == (b1, c1)
    assert jnp.allclose(out1, ref1, atol=1e-4, rtol=1e-4), "config-1 mismatch"

    # Config 2: multi batch/seq tiles with ragged tails (exercises masking and
    # the accumulate/finalize pipeline across several grid steps).
    b2, s2, h2, c2 = 10, 20, 48, 10
    k1, k2, k3, key = jax.random.split(key, 4)
    x2 = jax.random.normal(k1, (b2, s2, h2), jnp.float32)
    w2 = jax.random.normal(k2, (c2, h2), jnp.float32) * 0.1
    bias2 = jax.random.normal(k3, (c2,), jnp.float32) * 0.1
    out2 = jax.block_until_ready(
        comment_wise_linear_log_softmax(x2, w2, bias2, max_seq_tile=8))
    ref2 = _reference(x2, w2, bias2)
    assert out2.shape == (b2, c2)
    assert jnp.allclose(out2, ref2, atol=1e-4, rtol=1e-4), "config-2 mismatch"

    print("KERNEL_OK")
</pallas_src>

<mosaic_0001>
module attributes {stable_mosaic.version = 11 : i64} {
  func.func @_comment_logsoftmax_kernel(%arg0: i32, %arg1: i32, %arg2: memref<2x8x32xf32, #tpu.memory_space<vmem>>, %arg3: memref<32x128xf32, #tpu.memory_space<vmem>>, %arg4: memref<1x128xf32, #tpu.memory_space<vmem>>, %arg5: memref<2x128xf32, #tpu.memory_space<vmem>>, %arg6: memref<2x32xf32, #tpu.memory_space<vmem>>) attributes {dimension_semantics = [#tpu.dimension_semantics<parallel>, #tpu.dimension_semantics<arbitrary>], iteration_bounds = array<i64: 1, 1>, scalar_prefetch = 0 : i64, scratch_operands = 1 : i64, tpu.core_type = #tpu.core_type<tc>, window_params = [{transform_indices = @transform_0, window_bounds = array<i64: 2, 8, 32>}, {pipeline_mode = #tpu.pipeline_mode<synchronous>, transform_indices = @transform_1, window_bounds = array<i64: 32, 128>}, {pipeline_mode = #tpu.pipeline_mode<synchronous>, transform_indices = @transform_2, window_bounds = array<i64: 1, 128>}, {transform_indices = @transform_3, window_bounds = array<i64: 2, 128>}]} {
    %c0_i32 = arith.constant 0 : i32
    %0 = arith.cmpi eq, %arg1, %c0_i32 : i32
    %1 = arith.extui %0 : i1 to i32
    %c0_i32_0 = arith.constant 0 : i32
    %2 = arith.cmpi ne, %1, %c0_i32_0 : i32
    scf.if %2 {
      %cst_9 = arith.constant 0.000000e+00 : f32
      %11 = vector.broadcast %cst_9 : f32 to vector<2x32xf32>
      %c0_10 = arith.constant 0 : index
      %c0_11 = arith.constant 0 : index
      %12 = vector.load %arg6[%c0_10, %c0_11] : memref<2x32xf32, #tpu.memory_space<vmem>>, vector<2x32xf32>
      tpu.vector_store %arg6[%c0_10, %c0_11], %11 {strides = array<i32>} : memref<2x32xf32, #tpu.memory_space<vmem>>, vector<2x32xf32>,
    } else {
    }
    %c0 = arith.constant 0 : index
    %c0_1 = arith.constant 0 : index
    %c0_2 = arith.constant 0 : index
    %3 = vector.load %arg2[%c0, %c0_1, %c0_2] : memref<2x8x32xf32, #tpu.memory_space<vmem>>, vector<2x8x32xf32>
    %c0_3 = arith.constant 0 : index
    %c0_4 = arith.constant 0 : index
    %4 = vector.load %arg6[%c0_3, %c0_4] : memref<2x32xf32, #tpu.memory_space<vmem>>, vector<2x32xf32>
    %cst = arith.constant dense<0.000000e+00> : vector<2x32xf32>
    %5 = vector.multi_reduction <add>, %3, %cst [1] : vector<2x8x32xf32> to vector<2x32xf32>
    %6 = arith.addf %4, %5 : vector<2x32xf32>
    %c0_5 = arith.constant 0 : index
    %c0_6 = arith.constant 0 : index
    %7 = vector.load %arg6[%c0_5, %c0_6] : memref<2x32xf32, #tpu.memory_space<vmem>>, vector<2x32xf32>
    tpu.vector_store %arg6[%c0_5, %c0_6], %6 {strides = array<i32>} : memref<2x32xf32, #tpu.memory_space<vmem>>, vector<2x32xf32>,
    %c0_i32_7 = arith.constant 0 : i32
    %8 = arith.cmpi eq, %arg1, %c0_i32_7 : i32
    %9 = arith.extui %8 : i1 to i32
    %c0_i32_8 = arith.constant 0 : i32
    %10 = arith.cmpi ne, %9, %c0_i32_8 : i32
    scf.if %10 {
      %c0_9 = arith.constant 0 : index
      %c0_10 = arith.constant 0 : index
      %11 = vector.load %arg6[%c0_9, %c0_10] : memref<2x32xf32, #tpu.memory_space<vmem>>, vector<2x32xf32>
      %c0_11 = arith.constant 0 : index
      %c0_12 = arith.constant 0 : index
      %12 = vector.load %arg3[%c0_11, %c0_12] : memref<32x128xf32, #tpu.memory_space<vmem>>, vector<32x128xf32>
      %cst_13 = arith.constant dense<0.000000e+00> : vector<2x128xf32>
      %13 = tpu.matmul %11, %12, %cst_13 {dimension_numbers = #tpu.dot_dimension_numbers<[1], [0], [0], [1], [0, 0, 1, 1], [], []>} : vector<2x32xf32>, vector<32x128xf32>, vector<2x128xf32> -> vector<2x128xf32>
      %c0_14 = arith.constant 0 : index
      %c0_15 = arith.constant 0 : index
      %14 = vector.load %arg4[%c0_14, %c0_15] : memref<1x128xf32, #tpu.memory_space<vmem>>, vector<1x128xf32>
      %15 = vector.broadcast %14 : vector<1x128xf32> to vector<2x128xf32>
      %16 = arith.addf %13, %15 : vector<2x128xf32>
      %17 = tpu.iota {dimensions = array<i32: 1>} : vector<2x128xi32>
      %c16_i32 = arith.constant 16 : i32
      %18 = vector.broadcast %c16_i32 : i32 to vector<2x128xi32>
      %19 = arith.cmpi slt, %17, %18 : vector<2x128xi32>
      %cst_16 = arith.constant 0xFF800000 : f32
      %20 = vector.broadcast %cst_16 : f32 to vector<2x128xf32>
      %21 = arith.select %19, %16, %20 : vector<2x128xi1>, vector<2x128xf32>
      %cst_17 = arith.constant dense<0xFF800000> : vector<2xf32>
      %22 = vector.multi_reduction <maximumf>, %21, %cst_17 [1] : vector<2x128xf32> to vector<2xf32>
      %23 = vector.shape_cast %22 : vector<2xf32> to vector<2x1xf32>
      %24 = vector.broadcast %23 : vector<2x1xf32> to vector<2x128xf32>
      %25 = arith.subf %21, %24 : vector<2x128xf32>
      %26 = math.exp %25 : vector<2x128xf32>
      %cst_18 = arith.constant dense<0.000000e+00> : vector<2xf32>
      %27 = vector.multi_reduction <add>, %26, %cst_18 [1] : vector<2x128xf32> to vector<2xf32>
      %28 = vector.shape_cast %27 : vector<2xf32> to vector<2x1xf32>
      %29 = math.log %28 : vector<2x1xf32>
      %30 = vector.broadcast %29 : vector<2x1xf32> to vector<2x128xf32>
      %31 = arith.subf %25, %30 : vector<2x128xf32>
      %c0_19 = arith.constant 0 : index
      %c0_20 = arith.constant 0 : index
      %32 = vector.load %arg5[%c0_19, %c0_20] : memref<2x128xf32, #tpu.memory_space<vmem>>, vector<2x128xf32>
      tpu.vector_store %arg5[%c0_19, %c0_20], %31 {strides = array<i32>} : memref<2x128xf32, #tpu.memory_space<vmem>>, vector<2x128xf32>,
    } else {
    }
    return
  }
  func.func @transform_0(%arg0: i32, %arg1: i32) -> (i32, i32, i32) {
    %c0_i32 = arith.constant 0 : i32
    %c0_i32_0 = arith.constant 0 : i32
    return %arg0, %arg1, %c0_i32 : i32, i32, i32
  }
  func.func @transform_1(%arg0: i32, %arg1: i32) -> (i32, i32) {
    %c0_i32 = arith.constant 0 : i32
    %c0_i32_0 = arith.constant 0 : i32
    %c0_i32_1 = arith.constant 0 : i32
    return %c0_i32, %c0_i32_0 : i32, i32
  }
  func.func @transform_2(%arg0: i32, %arg1: i32) -> (i32, i32) {
    %c0_i32 = arith.constant 0 : i32
    %c0_i32_0 = arith.constant 0 : i32
    %c0_i32_1 = arith.constant 0 : i32
    return %c0_i32, %c0_i32_0 : i32, i32
  }
  func.func @transform_3(%arg0: i32, %arg1: i32) -> (i32, i32) {
    %c0_i32 = arith.constant 0 : i32
    %c0_i32_0 = arith.constant 0 : i32
    return %arg0, %c0_i32 : i32, i32
  }
}

</mosaic_0001>

<bundles_post_ra>
// kernel: tpu_custom_call.1
= control target key start
LH: loop header
LB: loop body
LE: loop exit
PB: predicated region body
PF: predicated region fallthrough
CT: control target
= control target key end

     0   :  { %8 = vsyncpa [#allocation4], 0  ;;  %s283_s0 = inlined_call_operand.hbm [shape: f32[2,8,32], index: 0, kind: input, shape index: {}]   ;;  %s284_s1 = inlined_call_operand.hbm [shape: f32[32,128], index: 1, kind: input, shape index: {}]   ;;  %s285_s2 = inlined_call_operand.vmem [shape: f32[1,128], index: 2, kind: input, shape index: {}]   ;;  %s286_s3 = inlined_call_operand.hbm [shape: f32[2,128], index: 3, kind: output, shape index: {}]  }
   0x1   :  { %9 = vsyncpa [#allocation7], 0 }
   0x2   :  { %10 = vsyncpa [#allocation5], 0  ;;  %s15_s14 = sshll.u32 %s283_s0, 4  ;;  %s240_s15 = smov [#allocation3]   ;;  %s16_s14 = int_to_ptr.hbm [resolvable:$true] %s15_s14 }
   0x3   :  { %s17_s16 = sshll.u32 %s240_s15, 4  ;;  %s28_s19 = sshll.u32 %s284_s1, 4  ;;  %s18_s16 = int_to_ptr.vmem [resolvable:$true] %s17_s16  ;;  %s29_s19 = int_to_ptr.hbm [resolvable:$true] %s28_s19 }
   0x4   :  { %s241_s20 = smov 128   ;;  %s242_s21 = smov 8  }
   0x5   :  { %23 = dma.hbm_to_vmem [thread:$0]  %s16_s14, 256, %s18_s16, [#allocation4], %s241_s20, %s241_s20, %s242_s21  }
   0x6   :  { %s243_s22 = smov [#allocation6]  }
   0x7   :  { %s30_s23 = sshll.u32 %s243_s22, 4  ;;  %s31_s23 = int_to_ptr.vmem [resolvable:$true] %s30_s23 }
   0x8   :  { %36 = dma.hbm_to_vmem [thread:$0]  %s29_s19, 512, %s31_s23, [#allocation7], %s241_s20, %s241_s20, %s242_s21  }
   0x9   :  { %234 = dma.done.wait [#allocation4], 256  }
   0xa   :  { %235 = vsyncadd [#allocation4], 4294967040 }
   0xb   :  { %236 = dma.done.wait [#allocation7], 512  }
   0xc   :  { %237 = vsyncadd [#allocation7], 4294966784  ;;  %vm51_vm0 = vcmask 254976   ;;  %v244_v0 = vmov 0.0   ;;  %vm56_vm1 = vcmask 261120   ;;  %v86_v1 = vld [vmem:[#allocation6 + $0x18] sm:$0xff]  ;;  %v114_v25 = vlaneseq }
   0xd   :  { %52 = vst.msk [vmem:[#allocation2] sm:$0x3] %vm51_vm0, %v244_v0  ;;  %v85_v2 = vld [vmem:[#allocation6 + $0x10] sm:$0xff]  ;;  %106 = vmatpush.msra.mxu0 %v86_v1  ;;  %v54_v4 = vld [vmem:[#allocation3 + $0x8] sm:$0xff]  ;;  %v84_v5 = vld [vmem:[#allocation6 + $0x8] sm:$0xff]  ;;  %vm73_vm2 = vcmask 1041409  }
   0xe   :  { %v53_v3 = vld [vmem:[#allocation3] sm:$0xff]  ;;  %v64_v7 = vsel %vm56_vm1, %v54_v4, 0.0  ;;  %v83_v10 = vld [vmem:[#allocation6] sm:$0xff]  ;;  %v115_v26 = vand.u32 127, %v114_v25  ;;  %v157_v27 = vld [vmem:[%s285_s2] ss:$0 sm:$0xff] }
   0xf   :  { %v57_v6 = vsel %vm56_vm1, %v53_v3, 0.0  ;;  %107 = vmatpush.msra.mxu0 %v85_v2  ;;  %v65_v9 = vrot.slane %v64_v7, 4  ;;  %vm118_vm4 = vcmask 1041408   ;;  %s245_s24 = smov [#allocation8]   ;;  %s139_s27 = sshll.u32 %s286_s3, 4  ;;  %s140_s27 = int_to_ptr.hbm [resolvable:$true] %s139_s27 }
  0x10   :  { %v58_v8 = vrot.slane %v57_v6, 4  ;;  %vm116_vm3 = vcmp.lt.s32.totalorder %v115_v26, 16  ;;  %s137_s25 = sshll.u32 %s245_s24, 4  ;;  %s138_s25 = int_to_ptr.vmem [resolvable:$true] %s137_s25 }
  0x11   :  { %108 = vmatpush.msra.mxu0 %v84_v5  ;;  %v66_v12 = vadd.f32 %v65_v9, %v64_v7 }
  0x12   :  { %v59_v11 = vadd.f32 %v58_v8, %v57_v6 }
  0x13   :  { %109 = vmatpush.msra.mxu0 %v83_v10  ;;  %v67_v14 = vrot.slane %v66_v12, 2 }
  0x14   :  { %v60_v13 = vrot.slane %v59_v11, 2  ;;  %v55_v19 = vld [vmem:[#allocation2] sm:$0x3] }
  0x15   :  { %v68_v16 = vadd.f32 %v67_v14, %v66_v12 }
  0x16   :  { %v61_v15 = vadd.f32 %v60_v13, %v59_v11 }
  0x17   :  { %v69_v18 = vrot.slane %v68_v16, 1 }
  0x18   :  { %v62_v17 = vrot.slane %v61_v15, 1 }
  0x19   :  { %v70_v21 = vadd.f32 %v69_v18, %v68_v16 }
  0x1a   :  { %v63_v20 = vadd.f32 %v62_v17, %v61_v15 }
  0x1c   :  { %v74_v22 = vsel %vm73_vm2, %v70_v21, %v63_v20 }
  0x1d   :  { %v76_v23 = vadd.f32 %v74_v22, %v55_v19 }
  0x1f   :  { %78 = vst.msk [vmem:[#allocation2] sm:$0x3] %vm51_vm0, %v76_v23 }
  0x26   :  { %v82_v24 = vld [vmem:[#allocation2] sm:$0x3] }
  0x27   :  { %150 = vmatmul.msk.f32.vlgmr.msra.gmra.mxu0 %vm56_vm1, %v82_v24 }
  0xa4   :  { %v111_v28 = vpop.f32.mrf.mxu0 }
  0xa5   :  { %v112_v29 = vadd.f32 %v157_v27, %v111_v28 }
  0xa7   :  { %v117_v30 = vsel %vm116_vm3, %v112_v29, -inf }
  0xa8   :  { %v119_v31 = vsel %vm118_vm4, %v117_v30, -inf }
  0xa9   :  { %120 = vmax.xlane.f32.xlu0 %v119_v31 }
 0x11c   :  { %v121_v32 = vpop.xlane.xlu0 %120 }
 0x11d   :  { %v122_v33 = vsub.f32 %v117_v30, %v121_v32 }
 0x11f   :  { %v123_v34 = vmul.f32 1.442695, %v122_v33 }
 0x121   :  { %158 = vpow2.f32 %v123_v34 }
 0x127   :  { %v159_v35 = vpop.eup %158 }
 0x128   :  { %v125_v36 = vsel %vm118_vm4, %v159_v35, 0.0 }
 0x129   :  { %126 = vadd.xlane.f32.xlu0 %v125_v36 }
 0x19c   :  { %v127_v37 = vpop.xlane.xlu0 %126 }
 0x19d   :  { %160 = vlog2.f32 %v127_v37 }
 0x1a3   :  { %v161_v38 = vpop.eup %160 }
 0x1a4   :  { %v129_v39 = vmul.f32 0.6931472, %v161_v38 }
 0x1a6   :  { %v130_v40 = vsub.f32 %v122_v33, %v129_v39 }
 0x1a8   :  { %131 = vst [vmem:[#allocation8] sm:$0x3] %v130_v40 }
 0x1a9   :  { %142 = dma.vmem_to_hbm [thread:$0]  %s138_s25, 32, %s140_s27, [#allocation5]  }
 0x1aa   :  { %238 = dma.done.wait [#allocation5], 32  }
 0x1ab   :  { %239 = vsyncadd [#allocation5], 4294967264 }
 0x1ac   :  { %147 = vsyncpa [#allocation4], 1 }
 0x1ad   :  { %148 = vsyncpa [#allocation7], 1 }
 0x1ae   :  { %149 = vsyncpa [#allocation5], 1 }

</bundles_post_ra>
